<compile_context>
chip_gen: v6e
topology: v6e:2x2x1
jax: 0.10.0
libtpu: 0.0.40
codegen_flags: <defaults>
</compile_context>

<pallas_src>
import functools

import jax
import jax.numpy as jnp
from jax.experimental import pallas as pl
from jax.experimental.pallas import tpu as pltpu


def _soft_dice_kernel(x_ref, y_ref, dc_ref, *, smooth):
    # x_ref, y_ref: (TILE_R, L_pad) tiles; dc_ref: (TILE_R, 1) per-row dice.
    x = x_ref[...].astype(jnp.float32)
    y = y_ref[...].astype(jnp.float32)

    tp = jnp.sum(x * y, axis=-1, keepdims=True)   # (TILE_R, 1)
    sx = jnp.sum(x, axis=-1, keepdims=True)
    sy = jnp.sum(y, axis=-1, keepdims=True)

    # 2*tp + fp + fn == sum(x) + sum(y)
    num = 2.0 * tp + smooth
    den = sx + sy + smooth
    dc_ref[...] = num / den


def soft_dice_loss(x, y, smooth=1.0):
    """Pallas TPU implementation of SoftDiceLoss.forward (dims=(-2, -1))."""
    assert x.shape == y.shape and x.ndim == 4, "expected NCHW inputs"
    B, C, H, W = x.shape
    N = B * C
    L = H * W

    x2 = x.reshape(N, L)
    y2 = y.reshape(N, L)

    # Pad the lane (reduction) axis to a multiple of 128 for dense vregs.
    # Zero padding does not change tp / sum(x) / sum(y).
    L_pad = ((L + 127) // 128) * 128
    if L_pad != L:
        x2 = jnp.pad(x2, ((0, 0), (0, L_pad - L)))
        y2 = jnp.pad(y2, ((0, 0), (0, L_pad - L)))

    # Rows per tile: target ~1M f32 elements (~4 MiB) per input tile so that
    # 2 inputs x 2 double-buffered tiles stay comfortably under VMEM limits
    # on all generations (incl. v7x's smaller VMEM).
    max_tile_elems = 1 << 20
    tile_r = max(8, (max(1, max_tile_elems // L_pad) // 8) * 8)
    n_pad8 = ((N + 7) // 8) * 8
    tile_r = min(tile_r, n_pad8)

    n_tiles = pl.cdiv(N, tile_r)
    N_pad = n_tiles * tile_r
    if N_pad != N:
        # Padded rows produce dc == 1 (smooth/smooth); they are sliced off
        # before the mean below, so the result is unaffected.
        x2 = jnp.pad(x2, ((0, N_pad - N), (0, 0)))
        y2 = jnp.pad(y2, ((0, N_pad - N), (0, 0)))

    kernel = functools.partial(_soft_dice_kernel, smooth=float(smooth))

    dc = pl.pallas_call(
        kernel,
        out_shape=jax.ShapeDtypeStruct((N_pad, 1), jnp.float32),
        grid_spec=pltpu.PrefetchScalarGridSpec(
            num_scalar_prefetch=0,
            grid=(n_tiles,),
            in_specs=[
                pl.BlockSpec((tile_r, L_pad), lambda i: (i, 0)),
                pl.BlockSpec((tile_r, L_pad), lambda i: (i, 0)),
            ],
            out_specs=pl.BlockSpec((tile_r, 1), lambda i: (i, 0)),
        ),
        compiler_params=pltpu.CompilerParams(
            dimension_semantics=("parallel",)
        ),
    )(x2, y2)

    dc_valid = dc[:N, 0]
    return 1.0 - dc_valid.mean()


def soft_dice_loss_ref(x, y, smooth=1.0):
    """Pure-JAX reference matching the PyTorch module semantics."""
    tp = (x * y).sum(axis=(-2, -1))
    fp = (x * (1.0 - y)).sum(axis=(-2, -1))
    fn = ((1.0 - x) * y).sum(axis=(-2, -1))
    dc = (2.0 * tp + smooth) / (2.0 * tp + fp + fn + smooth)
    return 1.0 - dc.mean()


if __name__ == "__main__":
    key = jax.random.PRNGKey(0)
    kx, ky = jax.random.split(key)

    B, C, H, W = 2, 4, 16, 16
    # x: soft predictions in [0, 1]; y: binary ground-truth mask
    x = jax.nn.sigmoid(jax.random.normal(kx, (B, C, H, W), dtype=jnp.float32))
    y = (jax.random.uniform(ky, (B, C, H, W), dtype=jnp.float32) > 0.5).astype(
        jnp.float32
    )

    loss = jax.block_until_ready(soft_dice_loss(x, y, smooth=1.0))
    ref = jax.block_until_ready(soft_dice_loss_ref(x, y, smooth=1.0))

    assert jnp.allclose(loss, ref, rtol=1e-5, atol=1e-6), (loss, ref)
    print("KERNEL_OK")
</pallas_src>

<mosaic_0001>
module attributes {stable_mosaic.version = 11 : i64} {
  func.func @_soft_dice_kernel(%arg0: i32, %arg1: memref<8x256xf32, #tpu.memory_space<vmem>>, %arg2: memref<8x256xf32, #tpu.memory_space<vmem>>, %arg3: memref<8x1xf32, #tpu.memory_space<vmem>>) attributes {dimension_semantics = [#tpu.dimension_semantics<parallel>], iteration_bounds = array<i64: 1>, scalar_prefetch = 0 : i64, scratch_operands = 0 : i64, tpu.core_type = #tpu.core_type<tc>, window_params = [{transform_indices = @transform_0, window_bounds = array<i64: 8, 256>}, {transform_indices = @transform_1, window_bounds = array<i64: 8, 256>}, {transform_indices = @transform_2, window_bounds = array<i64: 8, 1>}]} {
    %c0 = arith.constant 0 : index
    %c0_0 = arith.constant 0 : index
    %0 = vector.load %arg1[%c0, %c0_0] : memref<8x256xf32, #tpu.memory_space<vmem>>, vector<8x256xf32>
    %c0_1 = arith.constant 0 : index
    %c0_2 = arith.constant 0 : index
    %1 = vector.load %arg2[%c0_1, %c0_2] : memref<8x256xf32, #tpu.memory_space<vmem>>, vector<8x256xf32>
    %2 = arith.mulf %0, %1 : vector<8x256xf32>
    %cst = arith.constant dense<0.000000e+00> : vector<8xf32>
    %3 = vector.multi_reduction <add>, %2, %cst [1] : vector<8x256xf32> to vector<8xf32>
    %4 = vector.shape_cast %3 : vector<8xf32> to vector<8x1xf32>
    %cst_3 = arith.constant dense<0.000000e+00> : vector<8xf32>
    %5 = vector.multi_reduction <add>, %0, %cst_3 [1] : vector<8x256xf32> to vector<8xf32>
    %6 = vector.shape_cast %5 : vector<8xf32> to vector<8x1xf32>
    %cst_4 = arith.constant dense<0.000000e+00> : vector<8xf32>
    %7 = vector.multi_reduction <add>, %1, %cst_4 [1] : vector<8x256xf32> to vector<8xf32>
    %8 = vector.shape_cast %7 : vector<8xf32> to vector<8x1xf32>
    %cst_5 = arith.constant 2.000000e+00 : f32
    %9 = vector.broadcast %cst_5 : f32 to vector<8x1xf32>
    %10 = arith.mulf %9, %4 : vector<8x1xf32>
    %cst_6 = arith.constant 1.000000e+00 : f32
    %11 = vector.broadcast %cst_6 : f32 to vector<8x1xf32>
    %12 = arith.addf %10, %11 : vector<8x1xf32>
    %13 = arith.addf %6, %8 : vector<8x1xf32>
    %cst_7 = arith.constant 1.000000e+00 : f32
    %14 = vector.broadcast %cst_7 : f32 to vector<8x1xf32>
    %15 = arith.addf %13, %14 : vector<8x1xf32>
    %16 = arith.divf %12, %15 : vector<8x1xf32>
    %c0_8 = arith.constant 0 : index
    %c0_9 = arith.constant 0 : index
    %17 = vector.load %arg3[%c0_8, %c0_9] : memref<8x1xf32, #tpu.memory_space<vmem>>, vector<8x1xf32>
    tpu.vector_store %arg3[%c0_8, %c0_9], %16 {strides = array<i32>} : memref<8x1xf32, #tpu.memory_space<vmem>>, vector<8x1xf32>,
    return
  }
  func.func @transform_0(%arg0: i32) -> (i32, i32) {
    %c0_i32 = arith.constant 0 : i32
    %c0_i32_0 = arith.constant 0 : i32
    return %arg0, %c0_i32 : i32, i32
  }
  func.func @transform_1(%arg0: i32) -> (i32, i32) {
    %c0_i32 = arith.constant 0 : i32
    %c0_i32_0 = arith.constant 0 : i32
    return %arg0, %c0_i32 : i32, i32
  }
  func.func @transform_2(%arg0: i32) -> (i32, i32) {
    %c0_i32 = arith.constant 0 : i32
    %c0_i32_0 = arith.constant 0 : i32
    return %arg0, %c0_i32 : i32, i32
  }
}

</mosaic_0001>

<bundles_post_ra>
// kernel: tpu_custom_call.1
= control target key start
LH: loop header
LB: loop body
LE: loop exit
PB: predicated region body
PF: predicated region fallthrough
CT: control target
= control target key end

     0   :  { %7 = vsyncpa [#allocation3], 0  ;;  %s138_s0 = inlined_call_operand.hbm [shape: f32[8,256], index: 0, kind: input, shape index: {}]   ;;  %s139_s1 = inlined_call_operand.hbm [shape: f32[8,256], index: 1, kind: input, shape index: {}]   ;;  %s140_s2 = inlined_call_operand.vmem [shape: f32[8,1], index: 2, kind: output, shape index: {}]  }
   0x1   :  { %8 = vsyncpa [#allocation5], 0  ;;  %s112_s9 = smov [#allocation2]   ;;  %s113_s11 = smov [#allocation4]  }
   0x2   :  { %s15_s10 = sshll.u32 %s112_s9, 4  ;;  %s25_s12 = sshll.u32 %s113_s11, 4  ;;  %s16_s10 = int_to_ptr.vmem [resolvable:$true] %s15_s10  ;;  %s26_s12 = int_to_ptr.vmem [resolvable:$true] %s25_s12 }
   0x3   :  { %s76_s13 = scalar_lea.vmem %s16_s10, 256  ;;  %p81_p1 = scmp.lt.s32.totalorder %s16_s10, %s16_s10 }
   0x4   :  { %p77_p0 = scmp.ne.s32.totalorder %s16_s10, %s76_s13  ;;  %p82_p2 = scmp.lt.s32.totalorder %s76_s13, %s76_s13 }
   0x6   :  { %p83_p3 = por %p82_p2, %p81_p1 }
   0x8   :  { %p84_p4 = pnand %p83_p3, %p77_p0 }
   0xa   :  { %87 = shalt.err (!%p84_p4)
}
   0xb   :  { %18 = dma.hbm_to_vmem [thread:$0]  %s138_s0, 256, %s16_s10, [#allocation3]  }
   0xc   :  { %s96_s16 = scalar_lea.vmem %s26_s12, 256  ;;  %p101_p6 = scmp.lt.s32.totalorder %s26_s12, %s26_s12 }
   0xd   :  { %p97_p5 = scmp.ne.s32.totalorder %s26_s12, %s96_s16  ;;  %p102_p7 = scmp.lt.s32.totalorder %s96_s16, %s96_s16 }
   0xf   :  { %p103_p8 = por %p102_p7, %p101_p6 }
  0x11   :  { %p104_p9 = pnand %p103_p8, %p97_p5 }
  0x13   :  { %107 = shalt.err (!%p104_p9)
}
  0x14   :  { %28 = dma.hbm_to_vmem [thread:$0]  %s139_s1, 256, %s26_s12, [#allocation5]  }
  0x15   :  { %108 = dma.done.wait [#allocation3], 256  }
  0x16   :  { %109 = vsyncadd [#allocation3], 4294967040 }
  0x17   :  { %110 = dma.done.wait [#allocation5], 256  }
  0x18   :  { %111 = vsyncadd [#allocation5], 4294967040  ;;  %v35_v0 = vld [vmem:[#allocation2] sm:$0xff]  ;;  %v36_v1 = vld [vmem:[#allocation2 + $0x8] sm:$0xff]  ;;  %vm56_vm0 = vcmask 7168  }
  0x19   :  { %v37_v2 = vld [vmem:[#allocation4] sm:$0xff]  ;;  %v44_v3 = vadd.f32 %v36_v1, %v35_v0  ;;  %v38_v4 = vld [vmem:[#allocation4 + $0x8] sm:$0xff] }
  0x1a   :  { %v39_v5 = vmul.f32 %v37_v2, %v35_v0  ;;  %v40_v6 = vmul.f32 %v38_v4, %v36_v1  ;;  %v47_v7 = vadd.f32 %v38_v4, %v37_v2 }
  0x1b   :  { %45 = vadd.xlane.f32.xlu0 %v44_v3 }
  0x1c   :  { %v41_v8 = vadd.f32 %v40_v6, %v39_v5 }
  0x1e   :  { %42 = vadd.xlane.f32.xlu1 %v41_v8 }
  0x1f   :  { %48 = vadd.xlane.f32.xlu0 %v47_v7 }
  0xa4   :  { %v46_v9 = vpop.xlane.xlu0 %45 }
  0xa7   :  { %v43_v13 = vpop.xlane.xlu1 %42 }
  0xa8   :  { %v49_v10 = vpop.xlane.xlu0 %48  ;;  %v50_v14 = vmul.f32 2.0, %v43_v13 }
  0xa9   :  { %v52_v11 = vadd.f32 %v49_v10, %v46_v9 }
  0xaa   :  { %v51_v15 = vadd.f32 1.0, %v50_v14 }
  0xab   :  { %v53_v12 = vadd.f32 1.0, %v52_v11 }
  0xad   :  { %66 = vrcp.f32 %v53_v12 }
  0xba   :  { %v67_v16 = vpop.eup %66 }
  0xbb   :  { %v55_v17 = vmul.f32 %v67_v16, %v51_v15 }
  0xbd   :  { %57 = vst.msk [vmem:[%s140_s2] sm:$0xff] %vm56_vm0, %v55_v17 }
  0xbe   :  { %62 = vsyncpa [#allocation3], 1 }
  0xbf   :  { %63 = vsyncpa [#allocation5], 1 }

</bundles_post_ra>
